<compile_context>
chip_gen: v7x
topology: tpu7x:2x2x1
jax: 0.10.0
libtpu: 0.0.40
codegen_flags: <defaults>
</compile_context>

<pallas_src>
import functools

import jax
import jax.numpy as jnp
from jax.experimental import pallas as pl
from jax.experimental.pallas import tpu as pltpu


def _round_up(x, m):
    return (x + m - 1) // m * m


# ----------------------------------------------------------------------------
# kernel bodies  (working layout: factors on sublanes, batch on lanes)
# ----------------------------------------------------------------------------

_GATHER_CHUNK = 256   # one-hot slab width (rows); caps live intermediates


def _gather_cols(ids_row, table_ref):
    """Gather columns of a (F, rows) VMEM table into (F, TB) via one-hot MXU.

    ids_row: (1, TB) int32.  The one-hot is built in <=_GATHER_CHUNK row slabs
    so the largest live intermediate is (_GATHER_CHUNK, TB) f32.
    """
    _, rows = table_ref.shape
    tb = ids_row.shape[1]
    acc = None
    for r0 in range(0, rows, _GATHER_CHUNK):
        rsz = min(_GATHER_CHUNK, rows - r0)
        row_ids = jax.lax.broadcasted_iota(jnp.int32, (rsz, tb), 0) + r0
        onehot = (row_ids == ids_row).astype(jnp.float32)            # (rsz, TB)
        part = jnp.dot(table_ref[:, r0:r0 + rsz], onehot,
                       preferred_element_type=jnp.float32)           # (F, TB)
        acc = part if acc is None else acc + part
    return acc


def _classifier_logsoftmax(inv_pref, w_ref, b_ref, out_ref, *, vpu_classifier):
    """Linear + LogSoftmax on (F, TB) tiles.  ReverseLayerF forward = identity."""
    E = out_ref.shape[0]
    if vpu_classifier:
        # w: (F, E), b: (1, E).  Small E -> per-env broadcast-mul + sublane
        # reduce; every intermediate is a lane-dense (1, TB) row.
        w = w_ref[...]
        b = b_ref[...]
        logits = [jnp.sum(inv_pref * w[:, e:e + 1], axis=0, keepdims=True)
                  + b[0:1, e:e + 1] for e in range(E)]               # (1, TB)
        m = functools.reduce(jnp.maximum, logits)
        sumexp = functools.reduce(lambda a, x: a + x,
                                  [jnp.exp(l - m) for l in logits])
        lse = jnp.log(sumexp)
        # single lane-dense (E, TB) store
        out_ref[...] = jnp.concatenate([l - m - lse for l in logits], axis=0)
    else:
        # w: (E, F), b: (E, 1) — MXU path for larger env counts.
        logits = jnp.dot(w_ref[...], inv_pref,
                         preferred_element_type=jnp.float32) + b_ref[...]
        m = jnp.max(logits, axis=0, keepdims=True)
        shifted = logits - m
        out_ref[...] = shifted - jnp.log(
            jnp.sum(jnp.exp(shifted), axis=0, keepdims=True))


def _scores_and_classify(u_inv, i_inv, u_env, i_env, e_env, w_ref, b_ref,
                         inv_ref, env_ref, out_ref, *, vpu_classifier):
    inv_pref = u_inv * i_inv                                  # (F, TB) VPU
    env_pref = u_env * i_env * e_env                          # (F, TB) VPU
    inv_score = jnp.sum(inv_pref, axis=0, keepdims=True)      # (1, TB) sublane reduce
    env_mid = jnp.sum(env_pref, axis=0, keepdims=True)
    inv_ref[...] = inv_score
    env_ref[...] = inv_score + env_mid
    _classifier_logsoftmax(inv_pref, w_ref, b_ref, out_ref,
                           vpu_classifier=vpu_classifier)


def _invpref_fused_kernel(ids_ref, t_ui_ref, t_ii_ref, t_ue_ref, t_ie_ref,
                          t_e_ref, w_ref, b_ref,
                          inv_ref, env_ref, out_ref, *, vpu_classifier):
    """Gather-fused kernel: VMEM-resident (F, rows) tables, packed id tile."""
    ids = ids_ref[...]                 # (3, TB) int32, single DMA per step
    uid = ids[0:1, :]
    iid = ids[1:2, :]
    eid = ids[2:3, :]

    u_inv = _gather_cols(uid, t_ui_ref)
    i_inv = _gather_cols(iid, t_ii_ref)
    u_env = _gather_cols(uid, t_ue_ref)
    i_env = _gather_cols(iid, t_ie_ref)
    e_env = _gather_cols(eid, t_e_ref)

    _scores_and_classify(u_inv, i_inv, u_env, i_env, e_env, w_ref, b_ref,
                         inv_ref, env_ref, out_ref,
                         vpu_classifier=vpu_classifier)


def _invpref_pregathered_kernel(u_inv_ref, i_inv_ref, u_env_ref, i_env_ref,
                                e_env_ref, w_ref, b_ref,
                                inv_ref, env_ref, out_ref, *, vpu_classifier):
    """Fallback when the tables are too large to keep resident in VMEM."""
    _scores_and_classify(u_inv_ref[...], i_inv_ref[...], u_env_ref[...],
                         i_env_ref[...], e_env_ref[...], w_ref, b_ref,
                         inv_ref, env_ref, out_ref,
                         vpu_classifier=vpu_classifier)


# ----------------------------------------------------------------------------
# wrapper
# ----------------------------------------------------------------------------

def _choose_tile(B, max_tile):
    """Lane-dense tile (multiple of 128); grid >= 2 whenever B can be split."""
    max_tile = _round_up(int(max_tile), 128)
    b128 = _round_up(max(int(B), 1), 128)
    half = _round_up((b128 + 1) // 2, 128)
    return int(min(max_tile, max(128, half)))


def invpref_forward_pallas(users_id, items_id, envs_id,
                           emb_user_inv, emb_item_inv,
                           emb_user_env, emb_item_env, emb_env,
                           w, b, *, max_tile_fused=1024, max_tile_fallback=4096):
    """Fused InvPrefExplicit forward.

    users_id/items_id/envs_id: (B,) int32
    emb_*: (rows, F) float32 tables;  w: (E, F);  b: (E,)
    Returns (inv_score (B,), env_score (B,), env_out (B, E)).
    """
    B = int(users_id.shape[0])
    U, F = emb_user_inv.shape
    I = emb_item_inv.shape[0]
    Ev = emb_env.shape[0]
    E = w.shape[0]

    vpu_classifier = E <= 8
    if vpu_classifier:
        w_arg = jnp.asarray(w, jnp.float32).T            # (F, E)
        b_arg = jnp.asarray(b, jnp.float32).reshape(1, E)
    else:
        w_arg = jnp.asarray(w, jnp.float32)              # (E, F)
        b_arg = jnp.asarray(b, jnp.float32).reshape(E, 1)

    # fused (gather-in-kernel) path only when tables are comfortably VMEM
    # resident even double-buffered on v7x (64 MiB physical / 32 MiB scoped).
    table_bytes = 4 * F * (2 * U + 2 * I + Ev)
    fuse_gather = table_bytes <= 6 * 2**20 and max(U, I, Ev) <= 4096

    tile_b = _choose_tile(B, max_tile_fused if fuse_gather else max_tile_fallback)
    padded_b = _round_up(B, tile_b)
    grid_b = padded_b // tile_b
    pad = padded_b - B

    def pad_ids(ids):
        ids = jnp.asarray(ids, jnp.int32).reshape(-1)
        return jnp.pad(ids, (0, pad)) if pad else ids     # pad with valid row 0

    uid, iid, eid = pad_ids(users_id), pad_ids(items_id), pad_ids(envs_id)

    score_spec = pl.BlockSpec((1, tile_b), lambda i: (0, i))
    out_spec = pl.BlockSpec((E, tile_b), lambda i: (0, i))

    def full_spec(arr):
        return pl.BlockSpec(arr.shape, lambda i: (0, 0))

    out_shapes = (jax.ShapeDtypeStruct((1, padded_b), jnp.float32),
                  jax.ShapeDtypeStruct((1, padded_b), jnp.float32),
                  jax.ShapeDtypeStruct((E, padded_b), jnp.float32))
    cparams = pltpu.CompilerParams(dimension_semantics=("parallel",),
                                   vmem_limit_bytes=32 * 2**20)

    if fuse_gather:
        ids_packed = jnp.stack([uid, iid, eid], axis=0)    # (3, padded_b)

        def prep_table(t):
            t = jnp.transpose(jnp.asarray(t, jnp.float32))  # (F, rows)
            rows = t.shape[1]
            rpad = _round_up(rows, 128) - rows               # lane-align rows
            return jnp.pad(t, ((0, 0), (0, rpad))) if rpad else t

        tables = [prep_table(t) for t in (emb_user_inv, emb_item_inv,
                                          emb_user_env, emb_item_env, emb_env)]
        id_spec = pl.BlockSpec((3, tile_b), lambda i: (0, i))
        kernel = functools.partial(_invpref_fused_kernel,
                                   vpu_classifier=vpu_classifier)
        inv_s, env_s, env_o = pl.pallas_call(
            kernel,
            out_shape=out_shapes,
            grid_spec=pltpu.PrefetchScalarGridSpec(
                num_scalar_prefetch=0,
                grid=(grid_b,),
                in_specs=[id_spec] + [full_spec(t) for t in tables]
                         + [full_spec(w_arg), full_spec(b_arg)],
                out_specs=[score_spec, score_spec, out_spec]),
            compiler_params=cparams,
        )(ids_packed, *tables, w_arg, b_arg)
    else:
        # tables too big for VMEM: gather with XLA, stream (F, TB) tiles.
        gathered = [
            jnp.take(jnp.asarray(emb_user_inv, jnp.float32), uid, axis=0).T,
            jnp.take(jnp.asarray(emb_item_inv, jnp.float32), iid, axis=0).T,
            jnp.take(jnp.asarray(emb_user_env, jnp.float32), uid, axis=0).T,
            jnp.take(jnp.asarray(emb_item_env, jnp.float32), iid, axis=0).T,
            jnp.take(jnp.asarray(emb_env, jnp.float32), eid, axis=0).T,
        ]  # each (F, padded_b)
        emb_spec = pl.BlockSpec((F, tile_b), lambda i: (0, i))
        kernel = functools.partial(_invpref_pregathered_kernel,
                                   vpu_classifier=vpu_classifier)
        inv_s, env_s, env_o = pl.pallas_call(
            kernel,
            out_shape=out_shapes,
            grid_spec=pltpu.PrefetchScalarGridSpec(
                num_scalar_prefetch=0,
                grid=(grid_b,),
                in_specs=[emb_spec] * 5 + [full_spec(w_arg), full_spec(b_arg)],
                out_specs=[score_spec, score_spec, out_spec]),
            compiler_params=cparams,
        )(*gathered, w_arg, b_arg)

    return inv_s[0, :B], env_s[0, :B], env_o[:, :B].T


# ----------------------------------------------------------------------------
# model
# ----------------------------------------------------------------------------

class InvPrefExplicitPallas:
    """JAX/Pallas port of InvPrefExplicit (forward pass only)."""

    def __init__(self, user_num, item_num, env_num, factor_num, key):
        self.user_num = user_num
        self.item_num = item_num
        self.env_num = env_num
        self.factor_num = factor_num

        ks = jax.random.split(key, 7)
        std = 0.01
        self.embed_user_invariant = std * jax.random.normal(
            ks[0], (user_num, factor_num), jnp.float32)
        self.embed_item_invariant = std * jax.random.normal(
            ks[1], (item_num, factor_num), jnp.float32)
        self.embed_user_env_aware = std * jax.random.normal(
            ks[2], (user_num, factor_num), jnp.float32)
        self.embed_item_env_aware = std * jax.random.normal(
            ks[3], (item_num, factor_num), jnp.float32)
        self.embed_env = std * jax.random.normal(
            ks[4], (env_num, factor_num), jnp.float32)

        # classifier linear: xavier_uniform_ weight (env_num, factor_num),
        # default-uniform bias — same as nn.Linear(factor_num, env_num).
        bound_w = (6.0 / (factor_num + env_num)) ** 0.5
        self.classifier_w = jax.random.uniform(
            ks[5], (env_num, factor_num), jnp.float32,
            minval=-bound_w, maxval=bound_w)
        bound_b = 1.0 / (factor_num ** 0.5)
        self.classifier_b = jax.random.uniform(
            ks[6], (env_num,), jnp.float32, minval=-bound_b, maxval=bound_b)

    def forward(self, users_id, items_id, envs_id, alpha):
        # alpha only affects ReverseLayerF's backward; forward is identity.
        del alpha
        return invpref_forward_pallas(
            users_id, items_id, envs_id,
            self.embed_user_invariant, self.embed_item_invariant,
            self.embed_user_env_aware, self.embed_item_env_aware,
            self.embed_env, self.classifier_w, self.classifier_b)


# ----------------------------------------------------------------------------
# pure-JAX reference + self-test
# ----------------------------------------------------------------------------

def _reference_forward(model, users_id, items_id, envs_id):
    u_inv = jnp.take(model.embed_user_invariant, users_id, axis=0)
    i_inv = jnp.take(model.embed_item_invariant, items_id, axis=0)
    u_env = jnp.take(model.embed_user_env_aware, users_id, axis=0)
    i_env = jnp.take(model.embed_item_env_aware, items_id, axis=0)
    e_env = jnp.take(model.embed_env, envs_id, axis=0)
    inv_pref = u_inv * i_inv
    env_pref = u_env * i_env * e_env
    inv_score = jnp.sum(inv_pref, axis=1)
    env_score = inv_score + jnp.sum(env_pref, axis=1)
    logits = inv_pref @ model.classifier_w.T + model.classifier_b
    env_out = jax.nn.log_softmax(logits, axis=1)
    return inv_score, env_score, env_out


if __name__ == "__main__":
    key = jax.random.PRNGKey(0)
    k_model, k_u, k_i, k_e = jax.random.split(key, 4)

    USER_NUM, ITEM_NUM, ENV_NUM, FACTOR_NUM, BATCH = 12, 20, 2, 32, 10

    model = InvPrefExplicitPallas(USER_NUM, ITEM_NUM, ENV_NUM, FACTOR_NUM,
                                  k_model)

    users_id = jax.random.randint(k_u, (BATCH,), 0, USER_NUM)
    items_id = jax.random.randint(k_i, (BATCH,), 0, ITEM_NUM)
    envs_id = jax.random.randint(k_e, (BATCH,), 0, ENV_NUM)

    inv_score, env_score, env_out = model.forward(
        users_id, items_id, envs_id, alpha=0.5)
    jax.block_until_ready((inv_score, env_score, env_out))

    # sanity check against a pure-JAX reference
    ref_inv, ref_env, ref_out = _reference_forward(
        model, users_id, items_id, envs_id)
    assert inv_score.shape == (BATCH,)
    assert env_score.shape == (BATCH,)
    assert env_out.shape == (BATCH, ENV_NUM)
    assert jnp.allclose(inv_score, ref_inv, atol=1e-4)
    assert jnp.allclose(env_score, ref_env, atol=1e-4)
    assert jnp.allclose(env_out, ref_out, atol=1e-4)

    print("KERNEL_OK")
</pallas_src>

<mosaic_0001>
module attributes {stable_mosaic.version = 11 : i64} {
  func.func @_invpref_fused_kernel(%arg0: i32, %arg1: memref<3x128xi32, #tpu.memory_space<vmem>>, %arg2: memref<32x128xf32, #tpu.memory_space<vmem>>, %arg3: memref<32x128xf32, #tpu.memory_space<vmem>>, %arg4: memref<32x128xf32, #tpu.memory_space<vmem>>, %arg5: memref<32x128xf32, #tpu.memory_space<vmem>>, %arg6: memref<32x128xf32, #tpu.memory_space<vmem>>, %arg7: memref<32x2xf32, #tpu.memory_space<vmem>>, %arg8: memref<1x2xf32, #tpu.memory_space<vmem>>, %arg9: memref<1x128xf32, #tpu.memory_space<vmem>>, %arg10: memref<1x128xf32, #tpu.memory_space<vmem>>, %arg11: memref<2x128xf32, #tpu.memory_space<vmem>>) attributes {dimension_semantics = [#tpu.dimension_semantics<parallel>], iteration_bounds = array<i64: 1>, scalar_prefetch = 0 : i64, scratch_operands = 0 : i64, tpu.core_type = #tpu.core_type<tc>, window_params = [{transform_indices = @transform_0, window_bounds = array<i64: 3, 128>}, {pipeline_mode = #tpu.pipeline_mode<synchronous>, transform_indices = @transform_1, window_bounds = array<i64: 32, 128>}, {pipeline_mode = #tpu.pipeline_mode<synchronous>, transform_indices = @transform_2, window_bounds = array<i64: 32, 128>}, {pipeline_mode = #tpu.pipeline_mode<synchronous>, transform_indices = @transform_3, window_bounds = array<i64: 32, 128>}, {pipeline_mode = #tpu.pipeline_mode<synchronous>, transform_indices = @transform_4, window_bounds = array<i64: 32, 128>}, {pipeline_mode = #tpu.pipeline_mode<synchronous>, transform_indices = @transform_5, window_bounds = array<i64: 32, 128>}, {pipeline_mode = #tpu.pipeline_mode<synchronous>, transform_indices = @transform_6, window_bounds = array<i64: 32, 2>}, {pipeline_mode = #tpu.pipeline_mode<synchronous>, transform_indices = @transform_7, window_bounds = array<i64: 1, 2>}, {transform_indices = @transform_8, window_bounds = array<i64: 1, 128>}, {transform_indices = @transform_9, window_bounds = array<i64: 1, 128>}, {transform_indices = @transform_10, window_bounds = array<i64: 2, 128>}]} {
    %c0 = arith.constant 0 : index
    %c0_0 = arith.constant 0 : index
    %0 = vector.load %arg1[%c0, %c0_0] : memref<3x128xi32, #tpu.memory_space<vmem>>, vector<3x128xi32>
    %1 = vector.extract_strided_slice %0 {offsets = [0, 0], sizes = [1, 128], strides = [1, 1]} : vector<3x128xi32> to vector<1x128xi32>
    %2 = vector.extract_strided_slice %0 {offsets = [1, 0], sizes = [1, 128], strides = [1, 1]} : vector<3x128xi32> to vector<1x128xi32>
    %3 = vector.extract_strided_slice %0 {offsets = [2, 0], sizes = [1, 128], strides = [1, 1]} : vector<3x128xi32> to vector<1x128xi32>
    %4 = tpu.iota {dimensions = array<i32: 0>} : vector<128x128xi32>
    %c0_i32 = arith.constant 0 : i32
    %5 = vector.broadcast %c0_i32 : i32 to vector<128x128xi32>
    %6 = arith.addi %4, %5 : vector<128x128xi32>
    %7 = vector.broadcast %1 : vector<1x128xi32> to vector<128x128xi32>
    %8 = arith.cmpi eq, %6, %7 : vector<128x128xi32>
    %9 = arith.extui %8 : vector<128x128xi1> to vector<128x128xi32>
    %10 = arith.sitofp %9 : vector<128x128xi32> to vector<128x128xf32>
    %c0_1 = arith.constant 0 : index
    %c0_2 = arith.constant 0 : index
    %11 = vector.load %arg2[%c0_1, %c0_2] : memref<32x128xf32, #tpu.memory_space<vmem>>, vector<32x128xf32>
    %cst = arith.constant dense<0.000000e+00> : vector<32x128xf32>
    %12 = tpu.matmul %11, %10, %cst {dimension_numbers = #tpu.dot_dimension_numbers<[1], [0], [0], [1], [0, 0, 1, 1], [], []>} : vector<32x128xf32>, vector<128x128xf32>, vector<32x128xf32> -> vector<32x128xf32>
    %13 = tpu.iota {dimensions = array<i32: 0>} : vector<128x128xi32>
    %c0_i32_3 = arith.constant 0 : i32
    %14 = vector.broadcast %c0_i32_3 : i32 to vector<128x128xi32>
    %15 = arith.addi %13, %14 : vector<128x128xi32>
    %16 = vector.broadcast %2 : vector<1x128xi32> to vector<128x128xi32>
    %17 = arith.cmpi eq, %15, %16 : vector<128x128xi32>
    %18 = arith.extui %17 : vector<128x128xi1> to vector<128x128xi32>
    %19 = arith.sitofp %18 : vector<128x128xi32> to vector<128x128xf32>
    %c0_4 = arith.constant 0 : index
    %c0_5 = arith.constant 0 : index
    %20 = vector.load %arg3[%c0_4, %c0_5] : memref<32x128xf32, #tpu.memory_space<vmem>>, vector<32x128xf32>
    %cst_6 = arith.constant dense<0.000000e+00> : vector<32x128xf32>
    %21 = tpu.matmul %20, %19, %cst_6 {dimension_numbers = #tpu.dot_dimension_numbers<[1], [0], [0], [1], [0, 0, 1, 1], [], []>} : vector<32x128xf32>, vector<128x128xf32>, vector<32x128xf32> -> vector<32x128xf32>
    %22 = tpu.iota {dimensions = array<i32: 0>} : vector<128x128xi32>
    %c0_i32_7 = arith.constant 0 : i32
    %23 = vector.broadcast %c0_i32_7 : i32 to vector<128x128xi32>
    %24 = arith.addi %22, %23 : vector<128x128xi32>
    %25 = vector.broadcast %1 : vector<1x128xi32> to vector<128x128xi32>
    %26 = arith.cmpi eq, %24, %25 : vector<128x128xi32>
    %27 = arith.extui %26 : vector<128x128xi1> to vector<128x128xi32>
    %28 = arith.sitofp %27 : vector<128x128xi32> to vector<128x128xf32>
    %c0_8 = arith.constant 0 : index
    %c0_9 = arith.constant 0 : index
    %29 = vector.load %arg4[%c0_8, %c0_9] : memref<32x128xf32, #tpu.memory_space<vmem>>, vector<32x128xf32>
    %cst_10 = arith.constant dense<0.000000e+00> : vector<32x128xf32>
    %30 = tpu.matmul %29, %28, %cst_10 {dimension_numbers = #tpu.dot_dimension_numbers<[1], [0], [0], [1], [0, 0, 1, 1], [], []>} : vector<32x128xf32>, vector<128x128xf32>, vector<32x128xf32> -> vector<32x128xf32>
    %31 = tpu.iota {dimensions = array<i32: 0>} : vector<128x128xi32>
    %c0_i32_11 = arith.constant 0 : i32
    %32 = vector.broadcast %c0_i32_11 : i32 to vector<128x128xi32>
    %33 = arith.addi %31, %32 : vector<128x128xi32>
    %34 = vector.broadcast %2 : vector<1x128xi32> to vector<128x128xi32>
    %35 = arith.cmpi eq, %33, %34 : vector<128x128xi32>
    %36 = arith.extui %35 : vector<128x128xi1> to vector<128x128xi32>
    %37 = arith.sitofp %36 : vector<128x128xi32> to vector<128x128xf32>
    %c0_12 = arith.constant 0 : index
    %c0_13 = arith.constant 0 : index
    %38 = vector.load %arg5[%c0_12, %c0_13] : memref<32x128xf32, #tpu.memory_space<vmem>>, vector<32x128xf32>
    %cst_14 = arith.constant dense<0.000000e+00> : vector<32x128xf32>
    %39 = tpu.matmul %38, %37, %cst_14 {dimension_numbers = #tpu.dot_dimension_numbers<[1], [0], [0], [1], [0, 0, 1, 1], [], []>} : vector<32x128xf32>, vector<128x128xf32>, vector<32x128xf32> -> vector<32x128xf32>
    %40 = tpu.iota {dimensions = array<i32: 0>} : vector<128x128xi32>
    %c0_i32_15 = arith.constant 0 : i32
    %41 = vector.broadcast %c0_i32_15 : i32 to vector<128x128xi32>
    %42 = arith.addi %40, %41 : vector<128x128xi32>
    %43 = vector.broadcast %3 : vector<1x128xi32> to vector<128x128xi32>
    %44 = arith.cmpi eq, %42, %43 : vector<128x128xi32>
    %45 = arith.extui %44 : vector<128x128xi1> to vector<128x128xi32>
    %46 = arith.sitofp %45 : vector<128x128xi32> to vector<128x128xf32>
    %c0_16 = arith.constant 0 : index
    %c0_17 = arith.constant 0 : index
    %47 = vector.load %arg6[%c0_16, %c0_17] : memref<32x128xf32, #tpu.memory_space<vmem>>, vector<32x128xf32>
    %cst_18 = arith.constant dense<0.000000e+00> : vector<32x128xf32>
    %48 = tpu.matmul %47, %46, %cst_18 {dimension_numbers = #tpu.dot_dimension_numbers<[1], [0], [0], [1], [0, 0, 1, 1], [], []>} : vector<32x128xf32>, vector<128x128xf32>, vector<32x128xf32> -> vector<32x128xf32>
    %49 = arith.mulf %12, %21 : vector<32x128xf32>
    %50 = arith.mulf %30, %39 : vector<32x128xf32>
    %51 = arith.mulf %50, %48 : vector<32x128xf32>
    %cst_19 = arith.constant dense<0.000000e+00> : vector<128xf32>
    %52 = vector.multi_reduction <add>, %49, %cst_19 [0] : vector<32x128xf32> to vector<128xf32>
    %53 = vector.shape_cast %52 : vector<128xf32> to vector<1x128xf32>
    %cst_20 = arith.constant dense<0.000000e+00> : vector<128xf32>
    %54 = vector.multi_reduction <add>, %51, %cst_20 [0] : vector<32x128xf32> to vector<128xf32>
    %55 = vector.shape_cast %54 : vector<128xf32> to vector<1x128xf32>
    %c0_21 = arith.constant 0 : index
    %c0_22 = arith.constant 0 : index
    %56 = vector.load %arg9[%c0_21, %c0_22] : memref<1x128xf32, #tpu.memory_space<vmem>>, vector<1x128xf32>
    tpu.vector_store %arg9[%c0_21, %c0_22], %53 {strides = array<i32>} : memref<1x128xf32, #tpu.memory_space<vmem>>, vector<1x128xf32>,
    %57 = arith.addf %53, %55 : vector<1x128xf32>
    %c0_23 = arith.constant 0 : index
    %c0_24 = arith.constant 0 : index
    %58 = vector.load %arg10[%c0_23, %c0_24] : memref<1x128xf32, #tpu.memory_space<vmem>>, vector<1x128xf32>
    tpu.vector_store %arg10[%c0_23, %c0_24], %57 {strides = array<i32>} : memref<1x128xf32, #tpu.memory_space<vmem>>, vector<1x128xf32>,
    %c0_25 = arith.constant 0 : index
    %c0_26 = arith.constant 0 : index
    %59 = vector.load %arg7[%c0_25, %c0_26] : memref<32x2xf32, #tpu.memory_space<vmem>>, vector<32x2xf32>
    %c0_27 = arith.constant 0 : index
    %c0_28 = arith.constant 0 : index
    %60 = vector.load %arg8[%c0_27, %c0_28] : memref<1x2xf32, #tpu.memory_space<vmem>>, vector<1x2xf32>
    %61 = vector.extract_strided_slice %59 {offsets = [0, 0], sizes = [32, 1], strides = [1, 1]} : vector<32x2xf32> to vector<32x1xf32>
    %62 = vector.broadcast %61 : vector<32x1xf32> to vector<32x128xf32>
    %63 = arith.mulf %49, %62 : vector<32x128xf32>
    %cst_29 = arith.constant dense<0.000000e+00> : vector<128xf32>
    %64 = vector.multi_reduction <add>, %63, %cst_29 [0] : vector<32x128xf32> to vector<128xf32>
    %65 = vector.shape_cast %64 : vector<128xf32> to vector<1x128xf32>
    %66 = vector.extract_strided_slice %60 {offsets = [0, 0], sizes = [1, 1], strides = [1, 1]} : vector<1x2xf32> to vector<1x1xf32>
    %67 = vector.broadcast %66 : vector<1x1xf32> to vector<1x128xf32>
    %68 = arith.addf %65, %67 : vector<1x128xf32>
    %69 = vector.extract_strided_slice %59 {offsets = [0, 1], sizes = [32, 1], strides = [1, 1]} : vector<32x2xf32> to vector<32x1xf32>
    %70 = vector.broadcast %69 : vector<32x1xf32> to vector<32x128xf32>
    %71 = arith.mulf %49, %70 : vector<32x128xf32>
    %cst_30 = arith.constant dense<0.000000e+00> : vector<128xf32>
    %72 = vector.multi_reduction <add>, %71, %cst_30 [0] : vector<32x128xf32> to vector<128xf32>
    %73 = vector.shape_cast %72 : vector<128xf32> to vector<1x128xf32>
    %74 = vector.extract_strided_slice %60 {offsets = [0, 1], sizes = [1, 1], strides = [1, 1]} : vector<1x2xf32> to vector<1x1xf32>
    %75 = vector.broadcast %74 : vector<1x1xf32> to vector<1x128xf32>
    %76 = arith.addf %73, %75 : vector<1x128xf32>
    %77 = arith.maximumf %68, %76 : vector<1x128xf32>
    %78 = arith.subf %68, %77 : vector<1x128xf32>
    %79 = math.exp %78 : vector<1x128xf32>
    %80 = arith.subf %76, %77 : vector<1x128xf32>
    %81 = math.exp %80 : vector<1x128xf32>
    %82 = arith.addf %79, %81 : vector<1x128xf32>
    %83 = math.log %82 : vector<1x128xf32>
    %84 = arith.subf %68, %77 : vector<1x128xf32>
    %85 = arith.subf %84, %83 : vector<1x128xf32>
    %86 = arith.subf %76, %77 : vector<1x128xf32>
    %87 = arith.subf %86, %83 : vector<1x128xf32>
    %88 = tpu.concatenate %85, %87 in 0 : vector<1x128xf32>, vector<1x128xf32> -> vector<2x128xf32>
    %c0_31 = arith.constant 0 : index
    %c0_32 = arith.constant 0 : index
    %89 = vector.load %arg11[%c0_31, %c0_32] : memref<2x128xf32, #tpu.memory_space<vmem>>, vector<2x128xf32>
    tpu.vector_store %arg11[%c0_31, %c0_32], %88 {strides = array<i32>} : memref<2x128xf32, #tpu.memory_space<vmem>>, vector<2x128xf32>,
    return
  }
  func.func @transform_0(%arg0: i32) -> (i32, i32) {
    %c0_i32 = arith.constant 0 : i32
    %c0_i32_0 = arith.constant 0 : i32
    return %c0_i32, %arg0 : i32, i32
  }
  func.func @transform_1(%arg0: i32) -> (i32, i32) {
    %c0_i32 = arith.constant 0 : i32
    %c0_i32_0 = arith.constant 0 : i32
    %c0_i32_1 = arith.constant 0 : i32
    return %c0_i32, %c0_i32_0 : i32, i32
  }
  func.func @transform_2(%arg0: i32) -> (i32, i32) {
    %c0_i32 = arith.constant 0 : i32
    %c0_i32_0 = arith.constant 0 : i32
    %c0_i32_1 = arith.constant 0 : i32
    return %c0_i32, %c0_i32_0 : i32, i32
  }
  func.func @transform_3(%arg0: i32) -> (i32, i32) {
    %c0_i32 = arith.constant 0 : i32
    %c0_i32_0 = arith.constant 0 : i32
    %c0_i32_1 = arith.constant 0 : i32
    return %c0_i32, %c0_i32_0 : i32, i32
  }
  func.func @transform_4(%arg0: i32) -> (i32, i32) {
    %c0_i32 = arith.constant 0 : i32
    %c0_i32_0 = arith.constant 0 : i32
    %c0_i32_1 = arith.constant 0 : i32
    return %c0_i32, %c0_i32_0 : i32, i32
  }
  func.func @transform_5(%arg0: i32) -> (i32, i32) {
    %c0_i32 = arith.constant 0 : i32
    %c0_i32_0 = arith.constant 0 : i32
    %c0_i32_1 = arith.constant 0 : i32
    return %c0_i32, %c0_i32_0 : i32, i32
  }
  func.func @transform_6(%arg0: i32) -> (i32, i32) {
    %c0_i32 = arith.constant 0 : i32
    %c0_i32_0 = arith.constant 0 : i32
    %c0_i32_1 = arith.constant 0 : i32
    return %c0_i32, %c0_i32_0 : i32, i32
  }
  func.func @transform_7(%arg0: i32) -> (i32, i32) {
    %c0_i32 = arith.constant 0 : i32
    %c0_i32_0 = arith.constant 0 : i32
    %c0_i32_1 = arith.constant 0 : i32
    return %c0_i32, %c0_i32_0 : i32, i32
  }
  func.func @transform_8(%arg0: i32) -> (i32, i32) {
    %c0_i32 = arith.constant 0 : i32
    %c0_i32_0 = arith.constant 0 : i32
    return %c0_i32, %arg0 : i32, i32
  }
  func.func @transform_9(%arg0: i32) -> (i32, i32) {
    %c0_i32 = arith.constant 0 : i32
    %c0_i32_0 = arith.constant 0 : i32
    return %c0_i32, %arg0 : i32, i32
  }
  func.func @transform_10(%arg0: i32) -> (i32, i32) {
    %c0_i32 = arith.constant 0 : i32
    %c0_i32_0 = arith.constant 0 : i32
    return %c0_i32, %arg0 : i32, i32
  }
}

</mosaic_0001>

<bundles_post_ra>
// kernel: tpu_custom_call.1
= control target key start
LH: loop header
LB: loop body
LE: loop exit
PB: predicated region body
PF: predicated region fallthrough
CT: control target
= control target key end

     0   :  { %16 = vsyncpa [#allocation3], 0  ;;  %s2426_s0 = inlined_call_operand.vmem [shape: s32[3,128], index: 0, kind: input, shape index: {}]   ;;  %s2427_s1 = inlined_call_operand.vmem [shape: f32[32,128], index: 1, kind: input, shape index: {}]   ;;  %s2428_s2 = inlined_call_operand.hbm [shape: f32[32,128], index: 2, kind: input, shape index: {}]   ;;  %s2429_s3 = inlined_call_operand.hbm [shape: f32[32,128], index: 3, kind: input, shape index: {}]   ;;  %s2430_s4 = inlined_call_operand.hbm [shape: f32[32,128], index: 4, kind: input, shape index: {}]   ;;  %s2431_s5 = inlined_call_operand.hbm [shape: f32[32,128], index: 5, kind: input, shape index: {}]   ;;  %s2432_s6 = inlined_call_operand.vmem [shape: f32[32,2], index: 6, kind: input, shape index: {}]   ;;  %s2433_s7 = inlined_call_operand.vmem [shape: f32[1,2], index: 7, kind: input, shape index: {}]   ;;  %s2434_s8 = inlined_call_operand.hbm [shape: f32[1,128], index: 8, kind: output, shape index: {0}]   ;;  %s2435_s9 = inlined_call_operand.hbm [shape: f32[1,128], index: 9, kind: output, shape index: {1}]   ;;  %s2436_s10 = inlined_call_operand.hbm [shape: f32[2,128], index: 10, kind: output, shape index: {2}]  }
   0x1   :  { %17 = vsyncpa [#allocation6], 0 }
   0x2   :  { %18 = vsyncpa [#allocation9], 0 }
   0x3   :  { %19 = vsyncpa [#allocation4], 0 }
   0x4   :  { %20 = vsyncpa [#allocation12], 0  ;;  %s1665_s13 = smov [#allocation5]   ;;  %s1666_s15 = smov [#allocation2]  }
   0x5   :  { %s42_s14 = sshll.u32 %s1665_s13, 4  ;;  %s30_s16 = sshll.u32 %s1666_s15, 4  ;;  %s43_s14 = int_to_ptr.vmem [resolvable:$true] %s42_s14  ;;  %s1732_s16 = int_to_ptr.vmem [resolvable:$true] %s30_s16 }
   0x6   :  { %s1501_s19 = scalar_lea.hbm %s2429_s3, 512 }
   0x7   :  { %p1502_p0 = scmp.ne.s32.totalorder %s2429_s3, %s1501_s19  ;;  %p1505_p1 = scmp.lt.u32.totalorder %s1501_s19, %s2429_s3 }
   0x9   :  { %p1507_p2 = pnand %p1505_p1, %p1502_p0 }
   0xb   :  { %1510 = shalt.err (!%p1507_p2)
}
   0xc   :  { %s1511_s24 = scalar_lea.vmem %s43_s14, 512  ;;  %p1516_p4 = scmp.lt.s32.totalorder %s43_s14, %s43_s14 }
   0xd   :  { %p1512_p3 = scmp.ne.s32.totalorder %s43_s14, %s1511_s24  ;;  %p1517_p5 = scmp.lt.s32.totalorder %s1511_s24, %s1511_s24 }
   0xf   :  { %p1518_p6 = por %p1517_p5, %p1516_p4 }
  0x11   :  { %p1519_p7 = pnand %p1518_p6, %p1512_p3 }
  0x13   :  { %1522 = shalt.err (!%p1519_p7)
}
  0x14   :  { %s1667_s25 = smov 128   ;;  %s1668_s26 = smov 8  }
  0x15   :  { %48 = dma.hbm_to_vmem [thread:$0]  %s2429_s3, 512, %s43_s14, [#allocation6], %s1667_s25, %s1667_s25, %s1668_s26  }
  0x16   :  { %s1523_s11 = scalar_lea.hbm %s2428_s2, 512 }
  0x17   :  { %p1524_p8 = scmp.ne.s32.totalorder %s2428_s2, %s1523_s11  ;;  %p1527_p9 = scmp.lt.u32.totalorder %s1523_s11, %s2428_s2 }
  0x19   :  { %p1529_p10 = pnand %p1527_p9, %p1524_p8 }
  0x1b   :  { %1532 = shalt.err (!%p1529_p10)
}
  0x1c   :  { %s1533_s18 = scalar_lea.vmem %s1732_s16, 512  ;;  %p1538_p12 = scmp.lt.s32.totalorder %s1732_s16, %s1732_s16 }
  0x1d   :  { %p1534_p11 = scmp.ne.s32.totalorder %s1732_s16, %s1533_s18  ;;  %p1539_p13 = scmp.lt.s32.totalorder %s1533_s18, %s1533_s18 }
  0x1f   :  { %p1540_p0 = por %p1539_p13, %p1538_p12 }
  0x21   :  { %p1541_p1 = pnand %p1540_p0, %p1534_p11 }
  0x23   :  { %1544 = shalt.err (!%p1541_p1)
}
  0x24   :  { %36 = dma.hbm_to_vmem [thread:$0]  %s2428_s2, 512, %s1732_s16, [#allocation3], %s1667_s25, %s1667_s25, %s1668_s26  }
  0x25   :  { %s1669_s19 = smov [#allocation7]   ;;  %s1670_s21 = smov [#allocation8]  }
  0x26   :  { %s54_s20 = sshll.u32 %s1669_s19, 4  ;;  %s66_s22 = sshll.u32 %s1670_s21, 4  ;;  %s55_s20 = int_to_ptr.vmem [resolvable:$true] %s54_s20  ;;  %s1769_s22 = int_to_ptr.vmem [resolvable:$true] %s66_s22 }
  0x27   :  { %s1545_s27 = scalar_lea.hbm %s2430_s4, 512 }
  0x28   :  { %p1546_p2 = scmp.ne.s32.totalorder %s2430_s4, %s1545_s27  ;;  %p1549_p3 = scmp.lt.u32.totalorder %s1545_s27, %s2430_s4 }
  0x2a   :  { %p1551_p4 = pnand %p1549_p3, %p1546_p2 }
  0x2c   :  { %1554 = shalt.err (!%p1551_p4)
}
  0x2d   :  { %s1555_s2 = scalar_lea.vmem %s55_s20, 512  ;;  %p1560_p6 = scmp.lt.s32.totalorder %s55_s20, %s55_s20 }
  0x2e   :  { %p1556_p5 = scmp.ne.s32.totalorder %s55_s20, %s1555_s2  ;;  %p1561_p7 = scmp.lt.s32.totalorder %s1555_s2, %s1555_s2 }
  0x30   :  { %p1562_p8 = por %p1561_p7, %p1560_p6 }
  0x32   :  { %p1563_p9 = pnand %p1562_p8, %p1556_p5 }
  0x34   :  { %1566 = shalt.err (!%p1563_p9)
}
  0x35   :  { %60 = dma.hbm_to_vmem [thread:$0]  %s2430_s4, 512, %s55_s20, [#allocation6], %s1667_s25, %s1667_s25, %s1668_s26  }
  0x36   :  { %s1567_s17 = scalar_lea.hbm %s2431_s5, 512 }
  0x37   :  { %p1568_p10 = scmp.ne.s32.totalorder %s2431_s5, %s1567_s17  ;;  %p1571_p11 = scmp.lt.u32.totalorder %s1567_s17, %s2431_s5 }
  0x39   :  { %p1573_p12 = pnand %p1571_p11, %p1568_p10 }
  0x3b   :  { %1576 = shalt.err (!%p1573_p12)
}
  0x3c   :  { %s1577_s21 = scalar_lea.vmem %s1769_s22, 512  ;;  %p1582_p0 = scmp.lt.s32.totalorder %s1769_s22, %s1769_s22 }
  0x3d   :  { %p1578_p13 = scmp.ne.s32.totalorder %s1769_s22, %s1577_s21  ;;  %p1583_p1 = scmp.lt.s32.totalorder %s1577_s21, %s1577_s21 }
  0x3f   :  { %p1584_p2 = por %p1583_p1, %p1582_p0 }
  0x41   :  { %p1585_p3 = pnand %p1584_p2, %p1578_p13 }
  0x43   :  { %1588 = shalt.err (!%p1585_p3)
}
  0x44   :  { %72 = dma.hbm_to_vmem [thread:$0]  %s2431_s5, 512, %s1769_s22, [#allocation9], %s1667_s25, %s1667_s25, %s1668_s26  }
  0x45   :  { %1655 = dma.done.wait [#allocation3], 512  }
  0x46   :  { %1656 = vsyncadd [#allocation3], 4294966784 }
  0x47   :  { %1657 = dma.done.wait [#allocation6], 1024  }
  0x48   :  { %1658 = vsyncadd [#allocation6], 4294966272 }
  0x49   :  { %1659 = dma.done.wait [#allocation9], 512  }
  0x4a   :  { %1660 = vsyncadd [#allocation9], 4294966784  ;;  %v90_v0 = vlaneseq  ;;  %v1671_v1 = vmov 1   ;;  %v1672_v2 = vmov 0   ;;  %v1819_v7 = vld [vmem:[%s2426_s0] sm:$0x7] }
  0x4b   :  { %1493 = vset.pattern.permute.xlu1 %v1671_v1  ;;  %1492 = vset.pattern.permute.xlu0 %v1672_v2  ;;  %v159_v14 = vld [vmem:[%s2427_s1] sm:$0xff]  ;;  %v2461_v16 = vmov 0  ;;  %v1673_v17 = vmov 1.0|1.0   ;;  %v2463_v18 = vmov 0  ;;  %v2465_v21 = vmov 0 }
  0x4c   :  { %v1807_v3 = vshrl.u32 %v90_v0, 7  ;;  %v300_v15 = vld [vmem:[#allocation2] sm:$0xff]  ;;  %1146 = vmatprep.mubr.f32.mxu0 %v159_v14  ;;  %v2467_v22 = vmov 0  ;;  %v2469_v23 = vmov 0  ;;  %v2471_v26 = vmov 0  ;;  %v742_v35 = vld [vmem:[%s2432_s6 + $0x8] sm:$0xff] }
  0x4d   :  { %1184 = vmatprep.mubr.f32.mxu1 %v300_v15  ;;  %v741_v27 = vld [vmem:[%s2432_s6] sm:$0xff]  ;;  %v2473_v31 = vmov 0  ;;  %v2475_v34 = vmov 0  ;;  %v2477_v36 = vmov 0  ;;  %v2479_v37 = vmov 0  ;;  %v743_v41 = vld [vmem:[%s2432_s6 + $0x10] sm:$0xff] }
  0x4e   :  { %v1810_v4 = vsub.s32 0, %v1807_v3  ;;  %v250_v5 = vsub.s32 1, %v1807_v3  ;;  %v1814_v6 = vadd.s32 8, %v1807_v3  ;;  %v1822_v8 = vadd.s32 16, %v1807_v3  ;;  %790 = vperm.xlu1 %1493, %v741_v27   ;;  %748 = vperm.xlu0 %1492, %v741_v27   ;;  %v744_v48 = vld [vmem:[%s2432_s6 + $0x18] sm:$0xff]  ;;  %v160_v57 = vld [vmem:[%s2427_s1 + $0x8] sm:$0xff] }
  0x4f   :  { %v1825_v9 = vadd.s32 24, %v1807_v3  ;;  %v1835_v12 = vadd.s32 32, %v1807_v3  ;;  %v1838_v13 = vadd.s32 40, %v1807_v3  ;;  %v1875_v19 = vadd.s32 48, %v1807_v3  ;;  %v745_v53 = vld [vmem:[%s2433_s7] sm:$0x1] }
  0x50   :  { %v1829_v10 = vrot.slane %v1819_v7, %v1810_v4  ;;  %v1832_v11 = vrot.slane %v1819_v7, %v250_v5  ;;  %v1878_v20 = vadd.s32 56, %v1807_v3  ;;  %v1918_v24 = vadd.s32 64, %v1807_v3  ;;  %v301_v58 = vld [vmem:[#allocation2 + $0x8] sm:$0xff]  ;;  %v161_v59 = vld [vmem:[%s2427_s1 + $0x10] sm:$0xff]  ;;  %v162_v61 = vld [vmem:[%s2427_s1 + $0x18] sm:$0xff]  ;;  %s1674_s1 = smov [#allocation10]  }
  0x51   :  { %v1921_v25 = vadd.s32 72, %v1807_v3  ;;  %v1942_v28 = vadd.s32 80, %v1807_v3  ;;  %v1945_v29 = vadd.s32 88, %v1807_v3  ;;  %v1954_v30 = vadd.s32 96, %v1807_v3  ;;  %v302_v60 = vld [vmem:[#allocation2 + $0x10] sm:$0xff]  ;;  %v303_v62 = vld [vmem:[#allocation2 + $0x18] sm:$0xff] }
  0x52   :  { %vm111_vm0 = vcmp.eq.s32.totalorder %v1807_v3, %v1829_v10  ;;  %vm112_vm1 = vcmp.eq.s32.totalorder %v1814_v6, %v1829_v10  ;;  %vm252_vm2 = vcmp.eq.s32.totalorder %v1807_v3, %v1832_v11  ;;  %vm253_vm3 = vcmp.eq.s32.totalorder %v1814_v6, %v1832_v11  ;;  %794 = vperm.xlu1 %1493, %v742_v35   ;;  %v389_v63 = vld [vmem:[#allocation5] sm:$0xff]  ;;  %v479_v2 = vld [vmem:[#allocation7 + $0x8] sm:$0xff]  ;;  %v480_v5 = vld [vmem:[#allocation7 + $0x10] sm:$0xff]  ;;  %s848_s18 = sshll.u32 %s1674_s1, 4  ;;  %s849_s18 = int_to_ptr.vmem [resolvable:$true] %s848_s18 }
  0x53   :  { %vm1851_vm4 = vmpackc.low %vm112_vm1, %vm111_vm0  ;;  %vm113_vm5 = vcmp.eq.s32.totalorder %v1822_v8, %v1829_v10  ;;  %vm114_vm6 = vcmp.eq.s32.totalorder %v1825_v9, %v1829_v10  ;;  %vm254_vm7 = vcmp.eq.s32.totalorder %v1822_v8, %v1832_v11  ;;  %vm255_vm8 = vcmp.eq.s32.totalorder %v1825_v9, %v1832_v11  ;;  %753 = vperm.xlu0 %1492, %v742_v35   ;;  %v478_v0 = vld [vmem:[#allocation7] sm:$0xff]  ;;  %s1589_s3 = scalar_lea.vmem %s849_s18, 16  ;;  %s1593_s14 = scalar_lea.vmem %s849_s18, 32 }
  0x54   :  { %v2462_v16 = vsel %vm1851_vm4, 4294967295, %v2461_v16  ;;  %1305 = vmatprep.subr.msk.bf16.mxu0 %vm1851_vm4, %v1673_v17  ;;  %vm1866_vm9 = vmpackc.low %vm253_vm3, %vm252_vm2  ;;  %vm115_vm10 = vcmp.eq.s32.totalorder %v1835_v12, %v1829_v10  ;;  %vm116_vm11 = vcmp.eq.s32.totalorder %v1838_v13, %v1829_v10  ;;  %vm256_vm13 = vcmp.eq.s32.totalorder %v1835_v12, %v1832_v11  ;;  %p1590_p4 = scmp.ne.s32.totalorder %s849_s18, %s1589_s3  ;;  %p1594_p5 = scmp.lt.s32.totalorder %s849_s18, %s849_s18 }
  0x55   :  { %v2464_v18 = vsel %vm1866_vm9, 4294967295, %v2463_v18  ;;  %1337 = vmatprep.subr.msk.bf16.mxu1 %vm1866_vm9, %v1673_v17  ;;  %1307 = vmatpush3.bf16.msk.msra.mxu0 %vm1851_vm4, %v1673_v17  ;;  %vm1886_vm12 = vmpackc.low %vm114_vm6, %vm113_vm5  ;;  %vm257_vm14 = vcmp.eq.s32.totalorder %v1838_v13, %v1832_v11  ;;  %vm117_vm2 = vcmp.eq.s32.totalorder %v1875_v19, %v1829_v10  ;;  %vm118_vm3 = vcmp.eq.s32.totalorder %v1878_v20, %v1829_v10  ;;  %p1595_p6 = scmp.lt.s32.totalorder %s1593_s14, %s1589_s3 }
  0x56   :  { %v2466_v21 = vsel %vm1886_vm12, 4294967295, %v2465_v21  ;;  %1339 = vmatpush3.bf16.msk.msra.mxu1 %vm1866_vm9, %v1673_v17  ;;  %1309 = vmatprep.subr.msk.bf16.mxu0 %vm1886_vm12, %v1673_v17  ;;  %vm1906_vm15 = vmpackc.low %vm255_vm8, %vm254_vm7  ;;  %vm258_vm5 = vcmp.eq.s32.totalorder %v1875_v19, %v1832_v11  ;;  %vm259_vm6 = vcmp.eq.s32.totalorder %v1878_v20, %v1832_v11  ;;  %vm119_vm8 = vcmp.eq.s32.totalorder %v1918_v24, %v1829_v10 }
  0x57   :  { %v2468_v22 = vsel %vm1906_vm15, 4294967295, %v2467_v22  ;;  %1341 = vmatprep.subr.msk.bf16.mxu1 %vm1906_vm15, %v1673_v17  ;;  %vm1913_vm0 = vmpackc.low %vm116_vm11, %vm115_vm10  ;;  %vm120_vm10 = vcmp.eq.s32.totalorder %v1921_v25, %v1829_v10  ;;  %v1968_v32 = vadd.s32 104, %v1807_v3  ;;  %v569_v33 = vsub.s32 2, %v1807_v3  ;;  %798 = vperm.xlu1 %1493, %v743_v41   ;;  %p1596_p7 = por %p1595_p6, %p1594_p5 }
  0x58   :  { %v2470_v23 = vsel %vm1913_vm0, 4294967295, %v2469_v23  ;;  %vm1923_vm1 = vmpackc.low %vm257_vm14, %vm256_vm13  ;;  %vm260_vm13 = vcmp.eq.s32.totalorder %v1918_v24, %v1832_v11  ;;  %vm261_vm14 = vcmp.eq.s32.totalorder %v1921_v25, %v1832_v11  ;;  %v105_v44 = vadd.s32 112, %v1807_v3  ;;  %758 = vperm.xlu0 %1492, %v743_v41  }
  0x59   :  { %v2472_v26 = vsel %vm1923_vm1, 4294967295, %v2471_v26  ;;  %1311 = vmatpush3.bf16.msk.msra.mxu0 %vm1886_vm12, %v1673_v17  ;;  %vm1959_vm7 = vmpackc.low %vm118_vm3, %vm117_vm2  ;;  %vm121_vm2 = vcmp.eq.s32.totalorder %v1942_v28, %v1829_v10  ;;  %vm122_vm3 = vcmp.eq.s32.totalorder %v1945_v29, %v1829_v10  ;;  %v2018_v38 = vrot.slane %v1819_v7, %v569_v33  ;;  %v481_v7 = vld [vmem:[#allocation7 + $0x18] sm:$0xff]  ;;  %p1597_p8 = pnand %p1596_p7, %p1590_p4 }
  0x5a   :  { %1343 = vmatpush3.bf16.msk.msra.mxu1 %vm1906_vm15, %v1673_v17  ;;  %1313 = vmatprep.subr.msk.bf16.mxu0 %vm1913_vm0, %v1673_v17  ;;  %v2474_v31 = vsel %vm1959_vm7, 4294967295, %v2473_v31  ;;  %vm1971_vm11 = vmpackc.low %vm259_vm6, %vm258_vm5  ;;  %vm262_vm6 = vcmp.eq.s32.totalorder %v1942_v28, %v1832_v11  ;;  %v106_v45 = vadd.s32 120, %v1807_v3  ;;  %v2490_v46 = vmov 0 }
  0x5b   :  { %1345 = vmatprep.subr.msk.bf16.mxu1 %vm1923_vm1, %v1673_v17  ;;  %v2476_v34 = vsel %vm1971_vm11, 4294967295, %v2475_v34  ;;  %vm1998_vm5 = vmpackc.low %vm120_vm10, %vm119_vm8  ;;  %vm123_vm8 = vcmp.eq.s32.totalorder %v1954_v30, %v1829_v10  ;;  %vm124_vm10 = vcmp.eq.s32.totalorder %v1968_v32, %v1829_v10  ;;  %vm576_vm12 = vcmp.eq.s32.totalorder %v1838_v13, %v2018_v38  ;;  %802 = vperm.xlu1 %1493, %v744_v48  }
  0x5c   :  { %v2478_v36 = vsel %vm1998_vm5, 4294967295, %v2477_v36  ;;  %vm2020_vm15 = vmpackc.low %vm122_vm3, %vm121_vm2  ;;  %vm573_vm2 = vcmp.eq.s32.totalorder %v1822_v8, %v2018_v38  ;;  %vm574_vm3 = vcmp.eq.s32.totalorder %v1825_v9, %v2018_v38  ;;  %v2492_v47 = vmov 0  ;;  %763 = vperm.xlu0 %1492, %v744_v48   ;;  %v619_v8 = vld [vmem:[#allocation8] sm:$0xff]  ;;  %v621_v9 = vld [vmem:[#allocation8 + $0x10] sm:$0xff] }
  0x5d   :  { %1315 = vmatpush3.bf16.msk.msra.mxu0 %vm1913_vm0, %v1673_v17  ;;  %vm263_vm0 = vcmp.eq.s32.totalorder %v1945_v29, %v1832_v11  ;;  %vm2075_vm9 = vmpackc.low %vm574_vm3, %vm573_vm2  ;;  %vm581_vm2 = vcmp.eq.s32.totalorder %v1942_v28, %v2018_v38  ;;  %vm582_vm3 = vcmp.eq.s32.totalorder %v1945_v29, %v2018_v38  ;;  %v2495_v49 = vmov 0 }
  0x5e   :  { %1347 = vmatpush3.bf16.msk.msra.mxu1 %vm1923_vm1, %v1673_v17  ;;  %1317 = vmatprep.subr.msk.bf16.mxu0 %vm1959_vm7, %v1673_v17  ;;  %vm2009_vm1 = vmpackc.low %vm261_vm14, %vm260_vm13  ;;  %vm265_vm13 = vcmp.eq.s32.totalorder %v1968_v32, %v1832_v11  ;;  %v2491_v46 = vsel %vm2075_vm9, 4294967295, %v2490_v46  ;;  %vm2497_vm9 = vcmp.eq.s32.totalorder %v1918_v24, %v2018_v38  ;;  %v2498_v50 = vmov 0 }
  0x5f   :  { %1349 = vmatprep.subr.msk.bf16.mxu1 %vm1971_vm11, %v1673_v17  ;;  %v2480_v37 = vsel %vm2009_vm1, 4294967295, %v2479_v37  ;;  %vm2031_vm14 = vmpackc.low %vm263_vm0, %vm262_vm6  ;;  %vm575_vm6 = vcmp.eq.s32.totalorder %v1835_v12, %v2018_v38  ;;  %819 = vperm.xlu1 %1493, %v745_v53  }
  0x60   :  { %vm2051_vm0 = vmpackc.low %vm124_vm10, %vm123_vm8  ;;  %vm577_vm8 = vcmp.eq.s32.totalorder %v1875_v19, %v2018_v38  ;;  %781 = vperm.xlu0 %1492, %v745_v53  }
  0x61   :  { %1319 = vmatpush3.bf16.msk.msra.mxu0 %vm1959_vm7, %v1673_v17  ;;  %vm2086_vm10 = vmpackc.low %vm576_vm12, %vm575_vm6  ;;  %vm2494_vm12 = vcmp.eq.s32.totalorder %v1878_v20, %v2018_v38 }
  0x62   :  { %1351 = vmatpush3.bf16.msk.msra.mxu1 %vm1971_vm11, %v1673_v17  ;;  %1321 = vmatprep.subr.msk.bf16.mxu0 %vm1998_vm5, %v1673_v17  ;;  %vm2487_vm11 = vcmp.eq.s32.totalorder %v1954_v30, %v1832_v11  ;;  %v2493_v47 = vsel %vm2086_vm10, 4294967295, %v2492_v47  ;;  %vm2109_vm6 = vmpackc.low %vm2494_vm12, %vm577_vm8  ;;  %vm584_vm10 = vcmp.eq.s32.totalorder %v1968_v32, %v2018_v38  ;;  %vm585_vm8 = vcmp.eq.s32.totalorder %v105_v44, %v2018_v38 }
  0x63   :  { %1353 = vmatprep.subr.msk.bf16.mxu1 %vm2009_vm1, %v1673_v17  ;;  %vm2065_vm7 = vmpackc.low %vm265_vm13, %vm2487_vm11  ;;  %vm580_vm13 = vcmp.eq.s32.totalorder %v1921_v25, %v2018_v38  ;;  %v2496_v49 = vsel %vm2109_vm6, 4294967295, %v2495_v49  ;;  %vm583_vm11 = vcmp.eq.s32.totalorder %v1954_v30, %v2018_v38  ;;  %vm586_vm12 = vcmp.eq.s32.totalorder %v106_v45, %v2018_v38 }
  0x64   :  { %vm125_vm6 = vcmp.eq.s32.totalorder %v105_v44, %v1829_v10  ;;  %vm2131_vm4 = vmpackc.low %vm582_vm3, %vm581_vm2  ;;  %1494 = vset.pattern.permute.xlu0 %v1671_v1  ;;  %vm2511_vm3 = vnez %v2464_v18  ;;  %v390_v1 = vld [vmem:[#allocation5 + $0x8] sm:$0xff] }
  0x65   :  { %1323 = vmatpush3.bf16.msk.msra.mxu0 %vm1998_vm5, %v1673_v17  ;;  %vm126_vm5 = vcmp.eq.s32.totalorder %v106_v45, %v1829_v10  ;;  %vm2153_vm2 = vmpackc.low %vm586_vm12, %vm585_vm8  ;;  %vm2513_vm8 = vnez %v2468_v22  ;;  %vm2514_vm12 = vnez %v2470_v23  ;;  %v620_v10 = vld [vmem:[#allocation8 + $0x8] sm:$0xff] }
  0x66   :  { %1355 = vmatpush3.bf16.msk.msra.mxu1 %vm2009_vm1, %v1673_v17  ;;  %1325 = vmatprep.subr.msk.bf16.mxu0 %vm2020_vm15, %v1673_v17  ;;  %vm2123_vm1 = vmpackc.low %vm580_vm13, %vm2497_vm9  ;;  %vm266_vm9 = vcmp.eq.s32.totalorder %v105_v44, %v1832_v11  ;;  %vm267_vm13 = vcmp.eq.s32.totalorder %v106_v45, %v1832_v11  ;;  %v622_v11 = vld [vmem:[#allocation8 + $0x18] sm:$0xff] }
  0x67   :  { %1357 = vmatprep.subr.msk.bf16.mxu1 %vm2031_vm14, %v1673_v17  ;;  %v2499_v50 = vsel %vm2123_vm1, 4294967295, %v2498_v50  ;;  %vm2140_vm1 = vmpackc.low %vm584_vm10, %vm583_vm11 }
  0x68   :  { %vm2160_vm10 = vmpackc.low %vm126_vm5, %vm125_vm6  ;;  %vm2510_vm5 = vnez %v2462_v16  ;;  %vm2512_vm6 = vnez %v2466_v21 }
  0x69   :  { %1327 = vmatpush3.bf16.msk.msra.mxu0 %vm2020_vm15, %v1673_v17  ;;  %vm2164_vm11 = vmpackc.low %vm267_vm13, %vm266_vm9  ;;  %vm2515_vm9 = vnez %v2472_v26  ;;  %vm2516_vm13 = vnez %v2474_v31 }
  0x6a   :  { %1359 = vmatpush3.bf16.msk.msra.mxu1 %vm2031_vm14, %v1673_v17  ;;  %1329 = vmatprep.subr.msk.bf16.mxu0 %vm2051_vm0, %v1673_v17 }
  0x6b   :  { %1361 = vmatprep.subr.msk.bf16.mxu1 %vm2065_vm7, %v1673_v17 }
  0x6d   :  { %1331 = vmatpush3.bf16.msk.msra.mxu0 %vm2051_vm0, %v1673_v17 }
  0x6e   :  { %1363 = vmatpush3.bf16.msk.msra.mxu1 %vm2065_vm7, %v1673_v17  ;;  %1333 = vmatprep.subr.msk.bf16.mxu0 %vm2160_vm10, %v1673_v17 }
  0x6f   :  { %1365 = vmatprep.subr.msk.bf16.mxu1 %vm2164_vm11, %v1673_v17 }
  0x71   :  { %1335 = vmatpush3.bf16.msk.msra.mxu0 %vm2160_vm10, %v1673_v17 }
  0x72   :  { %1367 = vmatpush3.bf16.msk.msra.mxu1 %vm2164_vm11, %v1673_v17  ;;  %1369 = vmatprep.subr.msk.bf16.mxu0 %vm2510_vm5, %v1673_v17 }
  0x73   :  { %1401 = vmatprep.subr.msk.bf16.mxu1 %vm2511_vm3, %v1673_v17 }
  0x74   :  { %1147 = vmatmul.mubr.f32.vlgmr.msra.gmra.mrb[0].mxu0 %v160_v57 }
  0x75   :  { %1185 = vmatmul.mubr.f32.vlgmr.msra.gmra.mrb[0].mxu1 %v301_v58  ;;  %1371 = vmatpush3.bf16.msk.msra.mxu0 %vm2510_vm5, %v1673_v17  ;;  %vm2517_vm5 = vnez %v2476_v34 }
  0x76   :  { %1403 = vmatpush3.bf16.msk.msra.mxu1 %vm2511_vm3, %v1673_v17  ;;  %1149 = vmatprep.mubr.f32.mxu0 %v161_v59  ;;  %vm2518_vm3 = vnez %v2478_v36 }
  0x77   :  { %1187 = vmatprep.mubr.f32.mxu1 %v302_v60  ;;  %1373 = vmatprep.subr.msk.bf16.mxu0 %vm2512_vm6, %v1673_v17 }
  0x78   :  { %1150 = vmatmul.mubr.f32.gmra.mrb[2].mxu0 %v162_v61  ;;  %1405 = vmatprep.subr.msk.bf16.mxu1 %vm2513_vm8, %v1673_v17 }
  0x79   :  { %1188 = vmatmul.mubr.f32.gmra.mrb[2].mxu1 %v303_v62  ;;  %1375 = vmatpush3.bf16.msk.msra.mxu0 %vm2512_vm6, %v1673_v17  ;;  %vm2519_vm6 = vnez %v2480_v37 }
  0x7a   :  { %1407 = vmatpush3.bf16.msk.msra.mxu1 %vm2513_vm8, %v1673_v17  ;;  %1377 = vmatprep.subr.msk.bf16.mxu0 %vm2514_vm12, %v1673_v17  ;;  %vm571_vm8 = vcmp.eq.s32.totalorder %v1807_v3, %v2018_v38  ;;  %v391_v3 = vld [vmem:[#allocation5 + $0x10] sm:$0xff] }
  0x7b   :  { %1409 = vmatprep.subr.msk.bf16.mxu1 %vm2515_vm9, %v1673_v17  ;;  %1222 = vmatprep.mubr.f32.mxu0 %v389_v63 }
  0x7c   :  { %1260 = vmatprep.mubr.f32.mxu1 %v478_v0 }
  0x7d   :  { %1379 = vmatpush3.bf16.msk.msra.mxu0 %vm2514_vm12, %v1673_v17  ;;  %vm572_vm12 = vcmp.eq.s32.totalorder %v1814_v6, %v2018_v38  ;;  %v392_v6 = vld [vmem:[#allocation5 + $0x18] sm:$0xff] }
  0x7e   :  { %1411 = vmatpush3.bf16.msk.msra.mxu1 %vm2515_vm9, %v1673_v17  ;;  %1381 = vmatprep.subr.msk.bf16.mxu0 %vm2516_vm13, %v1673_v17 }
  0x7f   :  { %1413 = vmatprep.subr.msk.bf16.mxu1 %vm2517_vm5, %v1673_v17 }
  0x81   :  { %1383 = vmatpush3.bf16.msk.msra.mxu0 %vm2516_vm13, %v1673_v17 }
  0x82   :  { %1415 = vmatpush3.bf16.msk.msra.mxu1 %vm2517_vm5, %v1673_v17  ;;  %1385 = vmatprep.subr.msk.bf16.mxu0 %vm2518_vm3, %v1673_v17 }
  0x83   :  { %1417 = vmatprep.subr.msk.bf16.mxu1 %vm2519_vm6, %v1673_v17 }
  0x85   :  { %1387 = vmatpush3.bf16.msk.msra.mxu0 %vm2518_vm3, %v1673_v17 }
  0x86   :  { %1419 = vmatpush3.bf16.msk.msra.mxu1 %vm2519_vm6, %v1673_v17  ;;  %1389 = vmatprep.subr.msk.bf16.mxu0 %vm2020_vm15, %v1673_v17 }
  0x87   :  { %1421 = vmatprep.subr.msk.bf16.mxu1 %vm2031_vm14, %v1673_v17 }
  0x89   :  { %1391 = vmatpush3.bf16.msk.msra.mxu0 %vm2020_vm15, %v1673_v17  ;;  %vm1432_vm15 = vmpackc.low %vm572_vm12, %vm571_vm8 }
  0x8a   :  { %1423 = vmatpush3.bf16.msk.msra.mxu1 %vm2031_vm14, %v1673_v17  ;;  %1393 = vmatprep.subr.msk.bf16.mxu0 %vm2051_vm0, %v1673_v17  ;;  %vm2521_vm14 = vnez %v2493_v47 }
  0x8b   :  { %1425 = vmatprep.subr.msk.bf16.mxu1 %vm2065_vm7, %v1673_v17 }
  0x8d   :  { %1395 = vmatpush3.bf16.msk.msra.mxu0 %vm2051_vm0, %v1673_v17  ;;  %vm2522_vm0 = vnez %v2496_v49 }
  0x8e   :  { %1427 = vmatpush3.bf16.msk.msra.mxu1 %vm2065_vm7, %v1673_v17  ;;  %1397 = vmatprep.subr.msk.bf16.mxu0 %vm2160_vm10, %v1673_v17  ;;  %vm2520_vm7 = vnez %v2491_v46 }
  0x8f   :  { %1429 = vmatprep.subr.msk.bf16.mxu1 %vm2164_vm11, %v1673_v17 }
  0x91   :  { %1399 = vmatpush3.bf16.msk.msra.mxu0 %vm2160_vm10, %v1673_v17  ;;  %vm2523_vm10 = vnez %v2499_v50 }
  0x92   :  { %1431 = vmatpush3.bf16.msk.msra.mxu1 %vm2164_vm11, %v1673_v17  ;;  %1433 = vmatprep.subr.msk.bf16.mxu0 %vm1432_vm15, %v1673_v17 }
  0x93   :  { %1464 = vmatprep.subr.msk.bf16.mxu1 %vm1432_vm15, %v1673_v17 }
  0x94   :  { %1223 = vmatmul.mubr.f32.vlgmr.msra.gmra.mrb[4].mxu0 %v390_v1 }
  0x95   :  { %1261 = vmatmul.mubr.f32.vlgmr.msra.gmra.mrb[4].mxu1 %v479_v2  ;;  %1435 = vmatpush3.bf16.msk.msra.mxu0 %vm1432_vm15, %v1673_v17 }
  0x96   :  { %1472 = vmatpush3.bf16.msk.msra.mxu1 %vm1432_vm15, %v1673_v17  ;;  %1437 = vmatprep.subr.msk.bf16.mxu0 %vm2520_vm7, %v1673_v17 }
  0x97   :  { %1465 = vmatprep.subr.msk.bf16.mxu1 %vm2520_vm7, %v1673_v17  ;;  %1225 = vmatprep.mubr.f32.mxu0 %v391_v3 }
  0x98   :  { %1263 = vmatprep.mubr.f32.mxu1 %v480_v5  ;;  %1226 = vmatmul.mubr.f32.gmra.mrb[6].mxu0 %v392_v6 }
  0x99   :  { %1439 = vmatpush3.bf16.msk.msra.mxu0 %vm2520_vm7, %v1673_v17  ;;  %1264 = vmatmul.mubr.f32.gmra.mrb[6].mxu1 %v481_v7 }
  0x9a   :  { %1473 = vmatpush3.bf16.msk.msra.mxu1 %vm2520_vm7, %v1673_v17  ;;  %1441 = vmatprep.subr.msk.bf16.mxu0 %vm2521_vm14, %v1673_v17 }
  0x9b   :  { %1466 = vmatprep.subr.msk.bf16.mxu1 %vm2521_vm14, %v1673_v17  ;;  %1298 = vmatprep.mubr.f32.mxu0 %v619_v8 }
  0x9c   :  { %1301 = vmatprep.mubr.f32.mxu1 %v621_v9 }
  0x9d   :  { %1443 = vmatpush3.bf16.msk.msra.mxu0 %vm2521_vm14, %v1673_v17 }
  0x9e   :  { %1474 = vmatpush3.bf16.msk.msra.mxu1 %vm2521_vm14, %v1673_v17  ;;  %1445 = vmatprep.subr.msk.bf16.mxu0 %vm2522_vm0, %v1673_v17 }
  0x9f   :  { %1467 = vmatprep.subr.msk.bf16.mxu1 %vm2522_vm0, %v1673_v17 }
  0xa1   :  { %1447 = vmatpush3.bf16.msk.msra.mxu0 %vm2522_vm0, %v1673_v17 }
  0xa2   :  { %1475 = vmatpush3.bf16.msk.msra.mxu1 %vm2522_vm0, %v1673_v17  ;;  %1449 = vmatprep.subr.msk.bf16.mxu0 %vm2523_vm10, %v1673_v17 }
  0xa3   :  { %1468 = vmatprep.subr.msk.bf16.mxu1 %vm2523_vm10, %v1673_v17 }
  0xa5   :  { %1451 = vmatpush3.bf16.msk.msra.mxu0 %vm2523_vm10, %v1673_v17 }
  0xa6   :  { %1476 = vmatpush3.bf16.msk.msra.mxu1 %vm2523_vm10, %v1673_v17  ;;  %1453 = vmatprep.subr.msk.bf16.mxu0 %vm2131_vm4, %v1673_v17 }
  0xa7   :  { %1469 = vmatprep.subr.msk.bf16.mxu1 %vm2131_vm4, %v1673_v17 }
  0xa9   :  { %1455 = vmatpush3.bf16.msk.msra.mxu0 %vm2131_vm4, %v1673_v17 }
  0xaa   :  { %1477 = vmatpush3.bf16.msk.msra.mxu1 %vm2131_vm4, %v1673_v17  ;;  %1457 = vmatprep.subr.msk.bf16.mxu0 %vm2140_vm1, %v1673_v17 }
  0xab   :  { %1470 = vmatprep.subr.msk.bf16.mxu1 %vm2140_vm1, %v1673_v17 }
  0xad   :  { %1459 = vmatpush3.bf16.msk.msra.mxu0 %vm2140_vm1, %v1673_v17 }
  0xae   :  { %1478 = vmatpush3.bf16.msk.msra.mxu1 %vm2140_vm1, %v1673_v17  ;;  %1461 = vmatprep.subr.msk.bf16.mxu0 %vm2153_vm2, %v1673_v17 }
  0xaf   :  { %1471 = vmatprep.subr.msk.bf16.mxu1 %vm2153_vm2, %v1673_v17 }
  0xb1   :  { %1463 = vmatpush3.bf16.msk.msra.mxu0 %vm2153_vm2, %v1673_v17 }
  0xb2   :  { %1479 = vmatpush3.bf16.msk.msra.mxu1 %vm2153_vm2, %v1673_v17 }
  0xb4   :  { %1299 = vmatmul.mubr.f32.vlgmr.msra.gmra.mrb[8].mxu0 %v620_v10 }
  0xb5   :  { %1302 = vmatmul.mubr.f32.vlgmr.msra.gmra.mrb[8].mxu1 %v622_v11 }
  0xcd   :  { %v791_v12 = vpop.permute.xlu1 %790  ;;  %v749_v13 = vpop.permute.xlu0 %748 }
  0xd1   :  { %v795_v14 = vpop.permute.xlu1 %794 }
  0xd2   :  { %v754_v15 = vpop.permute.xlu0 %753 }
  0xd6   :  { %v799_v16 = vpop.permute.xlu1 %798 }
  0xd7   :  { %v759_v19 = vpop.permute.xlu0 %758 }
  0xda   :  { %v803_v28 = vpop.permute.xlu1 %802 }
  0xdb   :  { %v764_v35 = vpop.permute.xlu0 %763 }
  0xde   :  { %v820_v58 = vpop.permute.xlu1 %819 }
  0xdf   :  { %v782_v60 = vpop.permute.xlu0 %781  ;;  %v825_v0 = vrot.slane %v820_v58, %v1810_v4 }
  0xe0   :  { %v787_v3 = vrot.slane %v782_v60, %v1810_v4 }
 0x147   :  { %v1148_v18 = vpop.f32.mrb[0].mxu0 }
 0x148   :  { %v1186_v20 = vpop.f32.mrb[0].mxu1  ;;  %v229_v21 = vpop.f32.mrb[1].mxu0 }
 0x149   :  { %v709_v22 = vmul.f32 %v1186_v20, %v1148_v18  ;;  %v370_v23 = vpop.f32.mrb[1].mxu1 }
 0x14a   :  { %v708_v24 = vmul.f32 %v370_v23, %v229_v21 }
 0x14b   :  { %v806_v25 = vmul.f32 %v795_v14, %v709_v22  ;;  %v767_v26 = vmul.f32 %v754_v15, %v709_v22  ;;  %v1151_v27 = vpop.f32.mrb[2].mxu0 }
 0x14c   :  { %v720_v17 = vadd.f32 %v709_v22, %v708_v24  ;;  %v766_v29 = vmul.f32 %v749_v13, %v708_v24  ;;  %v805_v30 = vmul.f32 %v791_v12, %v708_v24  ;;  %v1189_v31 = vpop.f32.mrb[2].mxu1  ;;  %v239_v32 = vpop.f32.mrb[3].mxu0 }
 0x14d   :  { %v711_v33 = vmul.f32 %v1189_v31, %v1151_v27  ;;  %v380_v34 = vpop.f32.mrb[3].mxu1 }
 0x14e   :  { %v710_v36 = vmul.f32 %v380_v34, %v239_v32  ;;  %v809_v37 = vadd.f32 %v806_v25, %v805_v30  ;;  %v770_v38 = vadd.f32 %v767_v26, %v766_v29 }
 0x14f   :  { %v808_v39 = vmul.f32 %v803_v28, %v711_v33  ;;  %v769_v43 = vmul.f32 %v764_v35, %v711_v33 }
 0x150   :  { %v721_v40 = vadd.f32 %v720_v17, %v710_v36  ;;  %v768_v41 = vmul.f32 %v759_v19, %v710_v36  ;;  %v807_v42 = vmul.f32 %v799_v16, %v710_v36 }
 0x152   :  { %v722_v44 = vadd.f32 %v721_v40, %v711_v33  ;;  %v810_v45 = vadd.f32 %v809_v37, %v807_v42  ;;  %v771_v46 = vadd.f32 %v770_v38, %v768_v41 }
 0x154   :  { %v723_v47 = vrot.slane %v722_v44, 4  ;;  %v811_v48 = vadd.f32 %v810_v45, %v808_v39  ;;  %v772_v49 = vadd.f32 %v771_v46, %v769_v43 }
 0x156   :  { %v724_v50 = vadd.f32 %v723_v47, %v722_v44  ;;  %v812_v51 = vrot.slane %v811_v48, 4  ;;  %v773_v52 = vrot.slane %v772_v49, 4 }
 0x158   :  { %v813_v53 = vadd.f32 %v812_v51, %v811_v48  ;;  %v774_v54 = vadd.f32 %v773_v52, %v772_v49  ;;  %v725_v55 = vrot.slane %v724_v50, 2 }
 0x15a   :  { %v814_v56 = vrot.slane %v813_v53, 2  ;;  %v775_v57 = vrot.slane %v774_v54, 2  ;;  %v726_v59 = vadd.f32 %v725_v55, %v724_v50 }
 0x15c   :  { %v815_v61 = vadd.f32 %v814_v56, %v813_v53  ;;  %v776_v62 = vadd.f32 %v775_v57, %v774_v54  ;;  %v727_v63 = vrot.slane %v726_v59, 1 }
 0x15e   :  { %v816_v1 = vrot.slane %v815_v61, 1  ;;  %v777_v2 = vrot.slane %v776_v62, 1  ;;  %v2386_v5 = vadd.f32 %v727_v63, %v726_v59 }
 0x160   :  { %v817_v6 = vadd.f32 %v816_v1, %v815_v61  ;;  %v778_v7 = vadd.f32 %v777_v2, %v776_v62  ;;  %738 = vst [vmem:[#allocation10] sm:$0x1] %v2386_v5 }
 0x161   :  { %1600 = shalt.err (!%p1597_p8)
}
 0x162   :  { %s1601_s4 = scalar_lea.hbm %s2434_s8, 16 }
 0x163   :  { %p1602_p9 = scmp.ne.s32.totalorder %s2434_s8, %s1601_s4  ;;  %p1605_p10 = scmp.lt.u32.totalorder %s1601_s4, %s2434_s8 }
 0x165   :  { %p1607_p11 = pnand %p1605_p10, %p1602_p9 }
 0x167   :  { %1610 = shalt.err (!%p1607_p11)
}
 0x168   :  { %851 = dma.vmem_to_hbm [thread:$0]  %s849_s18, 16, %s2434_s8, [#allocation4]   ;;  %v826_v4 = vadd.f32 %v825_v0, %v817_v6  ;;  %v788_v8 = vadd.f32 %v787_v3, %v778_v7  ;;  %v1224_v12 = vpop.f32.mrb[4].mxu0  ;;  %v1262_v15 = vpop.f32.mrb[4].mxu1  ;;  %vm839_vm4 = vcmask 1040384  }
 0x169   :  { %v459_v16 = vpop.f32.mrb[5].mxu0  ;;  %v713_v18 = vmul.f32 %v1262_v15, %v1224_v12  ;;  %v548_v19 = vpop.f32.mrb[5].mxu1  ;;  %s1675_s8 = smov [#allocation11]   ;;  %s1676_s24 = smov [#allocation13]  }
 0x16a   :  { %v827_v9 = vmax.f32 %v788_v8, %v826_v4  ;;  %v712_v20 = vmul.f32 %v548_v19, %v459_v16  ;;  %s858_s23 = sshll.u32 %s1675_s8, 4  ;;  %s868_s27 = sshll.u32 %s1676_s24, 4  ;;  %s859_s23 = int_to_ptr.vmem [resolvable:$true] %s858_s23  ;;  %s869_s27 = int_to_ptr.vmem [resolvable:$true] %s868_s27 }
 0x16b   :  { %v1227_v21 = vpop.f32.mrb[6].mxu0  ;;  %s1611_s28 = scalar_lea.vmem %s859_s23, 16  ;;  %s1615_s29 = scalar_lea.vmem %s859_s23, 32 }
 0x16c   :  { %v828_v10 = vsub.f32 %v788_v8, %v827_v9  ;;  %v831_v11 = vsub.f32 %v826_v4, %v827_v9  ;;  %v1265_v22 = vpop.f32.mrb[6].mxu1  ;;  %v469_v23 = vpop.f32.mrb[7].mxu0  ;;  %p1612_p12 = scmp.ne.s32.totalorder %s859_s23, %s1611_s28  ;;  %p1616_p13 = scmp.lt.s32.totalorder %s859_s23, %s859_s23 }
 0x16d   :  { %v715_v24 = vmul.f32 %v1265_v22, %v1227_v21  ;;  %v558_v25 = vpop.f32.mrb[7].mxu1  ;;  %p1617_p0 = scmp.lt.s32.totalorder %s1615_s29, %s1611_s28 }
 0x16e   :  { %v829_v13 = vmul.f32 1.442695, %v828_v10  ;;  %v832_v14 = vmul.f32 1.442695, %v831_v11  ;;  %v714_v26 = vmul.f32 %v558_v25, %v469_v23 }
 0x16f   :  { %p1618_p1 = por %p1617_p0, %p1616_p13 }
 0x170   :  { %1495 = vpow2.f32 %v829_v13 }
 0x171   :  { %1497 = vpow2.f32 %v832_v14  ;;  %p1619_p2 = pnand %p1618_p1, %p1612_p12 }
 0x17a   :  { %v1496_v27 = vpop.eup %1495 }
 0x17b   :  { %v1498_v28 = vpop.eup %1497 }
 0x17c   :  { %v834_v17 = vadd.f32 %v1498_v28, %v1496_v27 }
 0x17e   :  { %1499 = vlog2.f32 %v834_v17 }
 0x187   :  { %v1300_v33 = vpop.f32.mrb[8].mxu0 }
 0x188   :  { %v1500_v29 = vpop.eup %1499  ;;  %v717_v35 = vmul.f32 %v1300_v33, %v713_v18  ;;  %v1303_v36 = vpop.f32.mrb[8].mxu1 }
 0x189   :  { %v836_v30 = vmul.f32 0.6931472, %v1500_v29  ;;  %v689_v37 = vpop.f32.mrb[9].mxu0  ;;  %v719_v38 = vmul.f32 %v1303_v36, %v715_v24  ;;  %v699_v40 = vpop.f32.mrb[9].mxu1 }
 0x18a   :  { %v716_v39 = vmul.f32 %v712_v20, %v689_v37  ;;  %v718_v41 = vmul.f32 %v714_v26, %v699_v40 }
 0x18b   :  { %v837_v31 = vsub.f32 %v828_v10, %v836_v30  ;;  %v838_v32 = vsub.f32 %v831_v11, %v836_v30 }
 0x18c   :  { %v729_v42 = vadd.f32 %v717_v35, %v716_v39 }
 0x18d   :  { %v840_v34 = vsel %vm839_vm4, %v837_v31, %v838_v32 }
 0x18e   :  { %841 = vst [vmem:[#allocation13] sm:$0x3] %v840_v34  ;;  %v730_v43 = vadd.f32 %v729_v42, %v718_v41 }
 0x190   :  { %v731_v44 = vadd.f32 %v730_v43, %v719_v38 }
 0x192   :  { %v732_v45 = vrot.slane %v731_v44, 4 }
 0x194   :  { %v733_v46 = vadd.f32 %v732_v45, %v731_v44 }
 0x196   :  { %v734_v47 = vrot.slane %v733_v46, 2 }
 0x198   :  { %v735_v48 = vadd.f32 %v734_v47, %v733_v46 }
 0x19a   :  { %v736_v49 = vrot.slane %v735_v48, 1 }
 0x19c   :  { %v737_v50 = vadd.f32 %v736_v49, %v735_v48 }
 0x19e   :  { %v739_v51 = vadd.f32 %v737_v50, %v2386_v5 }
 0x1a0   :  { %740 = vst [vmem:[#allocation11] sm:$0x1] %v739_v51 }
 0x1a1   :  { %1622 = shalt.err (!%p1619_p2)
}
 0x1a2   :  { %s1623_s6 = scalar_lea.hbm %s2435_s9, 16 }
 0x1a3   :  { %p1624_p3 = scmp.ne.s32.totalorder %s2435_s9, %s1623_s6  ;;  %p1627_p4 = scmp.lt.u32.totalorder %s1623_s6, %s2435_s9 }
 0x1a5   :  { %p1629_p5 = pnand %p1627_p4, %p1624_p3 }
 0x1a7   :  { %1632 = shalt.err (!%p1629_p5)
}
 0x1a8   :  { %861 = dma.vmem_to_hbm [thread:$0]  %s859_s23, 16, %s2435_s9, [#allocation12]  }
 0x1a9   :  { %s1633_s17 = scalar_lea.vmem %s869_s27, 32  ;;  %p1638_p7 = scmp.lt.s32.totalorder %s869_s27, %s869_s27 }
 0x1aa   :  { %p1634_p6 = scmp.ne.s32.totalorder %s869_s27, %s1633_s17  ;;  %p1639_p8 = scmp.lt.s32.totalorder %s1633_s17, %s1633_s17 }
 0x1ac   :  { %p1640_p9 = por %p1639_p8, %p1638_p7 }
 0x1ae   :  { %p1641_p10 = pnand %p1640_p9, %p1634_p6 }
 0x1b0   :  { %1644 = shalt.err (!%p1641_p10)
}
 0x1b1   :  { %s1645_s3 = scalar_lea.hbm %s2436_s10, 32 }
 0x1b2   :  { %p1646_p11 = scmp.ne.s32.totalorder %s2436_s10, %s1645_s3  ;;  %p1649_p12 = scmp.lt.u32.totalorder %s1645_s3, %s2436_s10 }
 0x1b4   :  { %p1651_p13 = pnand %p1649_p12, %p1646_p11 }
 0x1b6   :  { %1654 = shalt.err (!%p1651_p13)
}
 0x1b7   :  { %871 = dma.vmem_to_hbm [thread:$0]  %s869_s27, 32, %s2436_s10, [#allocation12]  }
 0x1b8   :  { %1661 = dma.done.wait [#allocation4], 16  }
 0x1b9   :  { %1662 = vsyncadd [#allocation4], 4294967280 }
 0x1ba   :  { %1663 = dma.done.wait [#allocation12], 48  }
 0x1bb   :  { %1664 = vsyncadd [#allocation12], 4294967248 }
 0x1bc   :  { %881 = vsyncpa [#allocation3], 1 }
 0x1bd   :  { %882 = vsyncpa [#allocation6], 1 }
 0x1be   :  { %883 = vsyncpa [#allocation9], 1 }
 0x1bf   :  { %884 = vsyncpa [#allocation4], 1 }
 0x1c0   :  { %885 = vsyncpa [#allocation12], 1 }

</bundles_post_ra>
